<compile_context>
chip_gen: v7x
topology: tpu7x:2x2x1
jax: 0.10.0
libtpu: 0.0.40
codegen_flags: <defaults>
</compile_context>

<pallas_src>
import jax
import jax.numpy as jnp
from jax.experimental import pallas as pl
from jax.experimental.pallas import tpu as pltpu

# Config ("5input" -> input_size=5)
INPUT_SIZE = 5
HIDDEN_LAYERS = [32, 32, 32, 32]      # 4 hidden layers
OUTPUT_SIZE = 1
NUM_LAYERS = len(HIDDEN_LAYERS) + 1   # 5 linear layers total
LANE = 128                            # padded lane width for every layer
ONES_LANE = LANE - 1                  # lane carrying the constant 1.0 (bias row)
BATCH = 8
DROPOUT = 0.01  # TODO(synk): dropout is identity in eval/inference mode; not applied in-kernel.


def _round_up(x, m):
    return (x + m - 1) // m * m


def _mlp_kernel(x_ref, w_ref, o_ref):
    """Fused 5-layer MLP on one batch tile.

    x_ref: (TILE_B, 128) bf16  -- input, zero-padded past col INPUT_SIZE,
                                  lane 127 holds the constant 1.0 (bias lane).
    w_ref: (5, 128, 128) bf16  -- augmented (in+bias, out) weights, zero-padded.
    o_ref: (TILE_B, 128) f32   -- col 0 is the real output, rest is padding.
    """
    h = x_ref[...]                          # bf16
    for i in range(NUM_LAYERS):             # static Python loop -> fully unrolled
        # Bias is row 127 of w_ref[i]; the ones-lane of h makes the MXU add it.
        acc = jnp.dot(h, w_ref[i], preferred_element_type=jnp.float32)
        if i < NUM_LAYERS - 1:
            # ReLU; lane 127 stays exactly 1.0 (1.0 > 0, exact in bf16).
            h = jnp.maximum(acc, 0.0).astype(jnp.bfloat16)
        else:
            o_ref[...] = acc                # final layer: no activation, f32 out


def pack_params(params):
    """Pack [(W(in,out) f32, b(out,) f32)] into one padded bf16 augmented weight slab."""
    w_slab = jnp.zeros((NUM_LAYERS, LANE, LANE), jnp.float32)
    for i, (w, b) in enumerate(params):
        fi, fo = w.shape
        w_slab = w_slab.at[i, :fi, :fo].set(w)
        w_slab = w_slab.at[i, ONES_LANE, :fo].set(b.reshape(-1))   # bias row
        if i < NUM_LAYERS - 1:
            # Propagate the ones-lane through hidden layers (identity on lane 127).
            w_slab = w_slab.at[i, ONES_LANE, ONES_LANE].set(1.0)
    return w_slab.astype(jnp.bfloat16)


def simple_nn_forward(x, w_slab, tile_b=512):
    """x: (B, INPUT_SIZE) f32.  Returns (B, OUTPUT_SIZE) f32."""
    B = x.shape[0]
    tb = min(tile_b, _round_up(B, 8))          # small batches: one 8-row-aligned tile
    B_pad = _round_up(B, tb)

    # Lane-dense, bf16 input slab (host-side layout plumbing only).
    x_pad = jnp.zeros((B_pad, LANE), jnp.bfloat16)
    x_pad = x_pad.at[:B, :INPUT_SIZE].set(x.astype(jnp.bfloat16))
    x_pad = x_pad.at[:, ONES_LANE].set(jnp.bfloat16(1.0))          # bias lane

    grid = (B_pad // tb,)

    # Advisory cost hint: keep XLA from over-serializing around this tiny call.
    flops = 2 * B * (INPUT_SIZE * HIDDEN_LAYERS[0]
                     + sum(HIDDEN_LAYERS[i - 1] * HIDDEN_LAYERS[i]
                           for i in range(1, len(HIDDEN_LAYERS)))
                     + HIDDEN_LAYERS[-1] * OUTPUT_SIZE)
    bytes_accessed = x_pad.size * 2 + w_slab.size * 2 + B_pad * LANE * 4

    out_pad = pl.pallas_call(
        _mlp_kernel,
        out_shape=jax.ShapeDtypeStruct((B_pad, LANE), jnp.float32),
        grid=grid,
        in_specs=[
            # x: tiled over batch, lane-dense
            pl.BlockSpec((tb, LANE), lambda i: (i, 0)),
            # weights: single slab, same block every grid step -> VMEM-resident
            pl.BlockSpec((NUM_LAYERS, LANE, LANE), lambda i: (0, 0, 0)),
        ],
        out_specs=pl.BlockSpec((tb, LANE), lambda i: (i, 0)),
        compiler_params=pltpu.CompilerParams(
            dimension_semantics=("parallel",)),
        cost_estimate=pl.CostEstimate(
            flops=flops, transcendentals=0, bytes_accessed=bytes_accessed),
    )(x_pad, w_slab)

    return out_pad[:B, :OUTPUT_SIZE]


def init_params(key):
    """Deterministic init mimicking PyTorch Linear default (uniform +/- 1/sqrt(fan_in))."""
    dims = [INPUT_SIZE] + HIDDEN_LAYERS + [OUTPUT_SIZE]
    params = []
    for i in range(len(dims) - 1):
        fan_in, fan_out = dims[i], dims[i + 1]
        key, kw, kb = jax.random.split(key, 3)
        bound = 1.0 / (fan_in ** 0.5)
        # Stored as (in, out): transpose of PyTorch's (out, in) weight.
        w = jax.random.uniform(kw, (fan_in, fan_out), jnp.float32, -bound, bound)
        b = jax.random.uniform(kb, (fan_out,), jnp.float32, -bound, bound)
        params.append((w, b))
    return params


def reference_forward(x, params):
    """Pure-JAX reference with matching bf16-input / f32-accumulation precision."""
    h = x.astype(jnp.bfloat16)
    for i, (w, b) in enumerate(params):
        acc = jnp.dot(h, w.astype(jnp.bfloat16),
                      preferred_element_type=jnp.float32)
        acc = acc + b.astype(jnp.bfloat16).astype(jnp.float32)
        if i < len(params) - 1:
            h = jnp.maximum(acc, 0.0).astype(jnp.bfloat16)
        else:
            h = acc
    return h


if __name__ == "__main__":
    key = jax.random.PRNGKey(0)
    key, kx = jax.random.split(key)
    x = jax.random.normal(kx, (BATCH, INPUT_SIZE), jnp.float32)
    params = init_params(key)
    w_slab = pack_params(params)

    out = simple_nn_forward(x, w_slab)
    out = jax.block_until_ready(out)

    ref = reference_forward(x, params)
    assert out.shape == (BATCH, OUTPUT_SIZE), out.shape
    assert jnp.allclose(out, ref, atol=1e-2, rtol=1e-2), "mismatch vs reference"

    print("KERNEL_OK")
</pallas_src>

<mosaic_0001>
module attributes {stable_mosaic.version = 11 : i64} {
  func.func @_mlp_kernel(%arg0: i32, %arg1: memref<8x128xbf16, #tpu.memory_space<vmem>>, %arg2: memref<5x128x128xbf16, #tpu.memory_space<vmem>>, %arg3: memref<8x128xf32, #tpu.memory_space<vmem>>) attributes {dimension_semantics = [#tpu.dimension_semantics<parallel>], iteration_bounds = array<i64: 1>, scalar_prefetch = 0 : i64, scratch_operands = 0 : i64, tpu.core_type = #tpu.core_type<tc>, window_params = [{transform_indices = @transform_0, window_bounds = array<i64: 8, 128>}, {pipeline_mode = #tpu.pipeline_mode<synchronous>, transform_indices = @transform_1, window_bounds = array<i64: 5, 128, 128>}, {transform_indices = @transform_2, window_bounds = array<i64: 8, 128>}]} {
    %c0 = arith.constant 0 : index
    %c0_0 = arith.constant 0 : index
    %0 = vector.load %arg1[%c0, %c0_0] : memref<8x128xbf16, #tpu.memory_space<vmem>>, vector<8x128xbf16>
    %c0_1 = arith.constant 0 : index
    %c0_2 = arith.constant 0 : index
    %c0_3 = arith.constant 0 : index
    %1 = vector.load %arg2[%c0_1, %c0_2, %c0_3] : memref<5x128x128xbf16, #tpu.memory_space<vmem>>, vector<1x128x128xbf16>
    %2 = vector.shape_cast %1 : vector<1x128x128xbf16> to vector<128x128xbf16>
    %cst = arith.constant dense<0.000000e+00> : vector<8x128xf32>
    %3 = tpu.matmul %0, %2, %cst {dimension_numbers = #tpu.dot_dimension_numbers<[1], [0], [0], [1], [0, 0, 1, 1], [], []>} : vector<8x128xbf16>, vector<128x128xbf16>, vector<8x128xf32> -> vector<8x128xf32>
    %cst_4 = arith.constant 0.000000e+00 : f32
    %4 = vector.broadcast %cst_4 : f32 to vector<8x128xf32>
    %5 = arith.maximumf %3, %4 : vector<8x128xf32>
    %6 = arith.truncf %5 : vector<8x128xf32> to vector<8x128xbf16>
    %c1 = arith.constant 1 : index
    %c0_5 = arith.constant 0 : index
    %c0_6 = arith.constant 0 : index
    %7 = vector.load %arg2[%c1, %c0_5, %c0_6] : memref<5x128x128xbf16, #tpu.memory_space<vmem>>, vector<1x128x128xbf16>
    %8 = vector.shape_cast %7 : vector<1x128x128xbf16> to vector<128x128xbf16>
    %cst_7 = arith.constant dense<0.000000e+00> : vector<8x128xf32>
    %9 = tpu.matmul %6, %8, %cst_7 {dimension_numbers = #tpu.dot_dimension_numbers<[1], [0], [0], [1], [0, 0, 1, 1], [], []>} : vector<8x128xbf16>, vector<128x128xbf16>, vector<8x128xf32> -> vector<8x128xf32>
    %cst_8 = arith.constant 0.000000e+00 : f32
    %10 = vector.broadcast %cst_8 : f32 to vector<8x128xf32>
    %11 = arith.maximumf %9, %10 : vector<8x128xf32>
    %12 = arith.truncf %11 : vector<8x128xf32> to vector<8x128xbf16>
    %c2 = arith.constant 2 : index
    %c0_9 = arith.constant 0 : index
    %c0_10 = arith.constant 0 : index
    %13 = vector.load %arg2[%c2, %c0_9, %c0_10] : memref<5x128x128xbf16, #tpu.memory_space<vmem>>, vector<1x128x128xbf16>
    %14 = vector.shape_cast %13 : vector<1x128x128xbf16> to vector<128x128xbf16>
    %cst_11 = arith.constant dense<0.000000e+00> : vector<8x128xf32>
    %15 = tpu.matmul %12, %14, %cst_11 {dimension_numbers = #tpu.dot_dimension_numbers<[1], [0], [0], [1], [0, 0, 1, 1], [], []>} : vector<8x128xbf16>, vector<128x128xbf16>, vector<8x128xf32> -> vector<8x128xf32>
    %cst_12 = arith.constant 0.000000e+00 : f32
    %16 = vector.broadcast %cst_12 : f32 to vector<8x128xf32>
    %17 = arith.maximumf %15, %16 : vector<8x128xf32>
    %18 = arith.truncf %17 : vector<8x128xf32> to vector<8x128xbf16>
    %c3 = arith.constant 3 : index
    %c0_13 = arith.constant 0 : index
    %c0_14 = arith.constant 0 : index
    %19 = vector.load %arg2[%c3, %c0_13, %c0_14] : memref<5x128x128xbf16, #tpu.memory_space<vmem>>, vector<1x128x128xbf16>
    %20 = vector.shape_cast %19 : vector<1x128x128xbf16> to vector<128x128xbf16>
    %cst_15 = arith.constant dense<0.000000e+00> : vector<8x128xf32>
    %21 = tpu.matmul %18, %20, %cst_15 {dimension_numbers = #tpu.dot_dimension_numbers<[1], [0], [0], [1], [0, 0, 1, 1], [], []>} : vector<8x128xbf16>, vector<128x128xbf16>, vector<8x128xf32> -> vector<8x128xf32>
    %cst_16 = arith.constant 0.000000e+00 : f32
    %22 = vector.broadcast %cst_16 : f32 to vector<8x128xf32>
    %23 = arith.maximumf %21, %22 : vector<8x128xf32>
    %24 = arith.truncf %23 : vector<8x128xf32> to vector<8x128xbf16>
    %c4 = arith.constant 4 : index
    %c0_17 = arith.constant 0 : index
    %c0_18 = arith.constant 0 : index
    %25 = vector.load %arg2[%c4, %c0_17, %c0_18] : memref<5x128x128xbf16, #tpu.memory_space<vmem>>, vector<1x128x128xbf16>
    %26 = vector.shape_cast %25 : vector<1x128x128xbf16> to vector<128x128xbf16>
    %cst_19 = arith.constant dense<0.000000e+00> : vector<8x128xf32>
    %27 = tpu.matmul %24, %26, %cst_19 {dimension_numbers = #tpu.dot_dimension_numbers<[1], [0], [0], [1], [0, 0, 1, 1], [], []>} : vector<8x128xbf16>, vector<128x128xbf16>, vector<8x128xf32> -> vector<8x128xf32>
    %c0_20 = arith.constant 0 : index
    %c0_21 = arith.constant 0 : index
    %28 = vector.load %arg3[%c0_20, %c0_21] : memref<8x128xf32, #tpu.memory_space<vmem>>, vector<8x128xf32>
    tpu.vector_store %arg3[%c0_20, %c0_21], %27 {strides = array<i32>} : memref<8x128xf32, #tpu.memory_space<vmem>>, vector<8x128xf32>,
    return
  }
  func.func @transform_0(%arg0: i32) -> (i32, i32) {
    %c0_i32 = arith.constant 0 : i32
    %c0_i32_0 = arith.constant 0 : i32
    return %arg0, %c0_i32 : i32, i32
  }
  func.func @transform_1(%arg0: i32) -> (i32, i32, i32) {
    %c0_i32 = arith.constant 0 : i32
    %c0_i32_0 = arith.constant 0 : i32
    %c0_i32_1 = arith.constant 0 : i32
    %c0_i32_2 = arith.constant 0 : i32
    return %c0_i32, %c0_i32_0, %c0_i32_1 : i32, i32, i32
  }
  func.func @transform_2(%arg0: i32) -> (i32, i32) {
    %c0_i32 = arith.constant 0 : i32
    %c0_i32_0 = arith.constant 0 : i32
    return %arg0, %c0_i32 : i32, i32
  }
}

</mosaic_0001>

<bundles_post_ra>
// kernel: tpu_custom_call.1
= control target key start
LH: loop header
LB: loop body
LE: loop exit
PB: predicated region body
PF: predicated region fallthrough
CT: control target
= control target key end

     0   :  { %7 = vsyncpa [#allocation3], 0  ;;  %s1008_s0 = inlined_call_operand.hbm [shape: bf16[8,128], index: 0, kind: input, shape index: {}]   ;;  %s1009_s1 = inlined_call_operand.hbm [shape: bf16[5,128,128], index: 1, kind: input, shape index: {}]   ;;  %s1010_s2 = inlined_call_operand.hbm [shape: f32[8,128], index: 2, kind: output, shape index: {}]  }
   0x1   :  { %8 = vsyncpa [#allocation6], 0 }
   0x2   :  { %9 = vsyncpa [#allocation4], 0  ;;  %s893_s9 = smov [#allocation2]   ;;  %s894_s11 = smov [#allocation5]  }
   0x3   :  { %s16_s10 = sshll.u32 %s893_s9, 4  ;;  %s25_s12 = sshll.u32 %s894_s11, 4  ;;  %s17_s10 = int_to_ptr.vmem [resolvable:$true] %s16_s10  ;;  %s915_s12 = int_to_ptr.vmem [resolvable:$true] %s25_s12 }
   0x4   :  { %s821_s15 = scalar_lea.hbm %s1008_s0, 64 }
   0x5   :  { %p822_p0 = scmp.ne.s32.totalorder %s1008_s0, %s821_s15  ;;  %p825_p1 = scmp.lt.u32.totalorder %s821_s15, %s1008_s0 }
   0x7   :  { %p827_p2 = pnand %p825_p1, %p822_p0 }
   0x9   :  { %830 = shalt.err (!%p827_p2)
}
   0xa   :  { %s831_s20 = scalar_lea.vmem %s17_s10, 64  ;;  %p836_p4 = scmp.lt.s32.totalorder %s17_s10, %s17_s10 }
   0xb   :  { %p832_p3 = scmp.ne.s32.totalorder %s17_s10, %s831_s20  ;;  %p837_p5 = scmp.lt.s32.totalorder %s831_s20, %s831_s20 }
   0xd   :  { %p838_p6 = por %p837_p5, %p836_p4 }
   0xf   :  { %p839_p7 = pnand %p838_p6, %p832_p3 }
  0x11   :  { %842 = shalt.err (!%p839_p7)
}
  0x12   :  { %19 = dma.hbm_to_vmem [thread:$0]  %s1008_s0, 64, %s17_s10, [#allocation3]  }
  0x13   :  { %s843_s25 = scalar_lea.hbm %s1009_s1, 5120 }
  0x14   :  { %p844_p8 = scmp.ne.s32.totalorder %s1009_s1, %s843_s25  ;;  %p847_p9 = scmp.lt.u32.totalorder %s843_s25, %s1009_s1 }
  0x16   :  { %p849_p10 = pnand %p847_p9, %p844_p8 }
  0x18   :  { %852 = shalt.err (!%p849_p10)
}
  0x19   :  { %s853_s30 = scalar_lea.vmem %s915_s12, 5120  ;;  %p858_p12 = scmp.lt.s32.totalorder %s915_s12, %s915_s12 }
  0x1a   :  { %p854_p11 = scmp.ne.s32.totalorder %s915_s12, %s853_s30  ;;  %p859_p13 = scmp.lt.s32.totalorder %s853_s30, %s853_s30 }
  0x1c   :  { %p860_p0 = por %p859_p13, %p858_p12 }
  0x1e   :  { %p861_p1 = pnand %p860_p0, %p854_p11 }
  0x20   :  { %864 = shalt.err (!%p861_p1)
}
  0x21   :  { %s895_s0 = smov 64   ;;  %s896_s3 = smov 4  }
  0x22   :  { %31 = dma.hbm_to_vmem [thread:$0]  %s1009_s1, 5120, %s915_s12, [#allocation6], %s895_s0, %s895_s0, %s896_s3  }
  0x23   :  { %887 = dma.done.wait [#allocation3], 64  }
  0x24   :  { %888 = vsyncadd [#allocation3], 4294967232 }
  0x25   :  { %889 = dma.done.wait [#allocation6], 5120  }
  0x26   :  { %890 = vsyncadd [#allocation6], 4294962176  ;;  %v897_v0 = vmov 0.0   ;;  %vm898_vm0 = vmmov 0   ;;  %v781_v1 = vld [vmem:[#allocation5] sm:$0xff]   ;;  %v782_v2 = vld [vmem:[#allocation5 + $0x8] sm:$0xff]  }
  0x27   :  { %674 = vmatprep.subr.bf16.mxu0 %v897_v0  ;;  %690 = vmatprep.mubr.msk.bf16.mxu0 %vm898_vm0, %v897_v0  ;;  %v783_v3 = vld [vmem:[#allocation5 + $0x10] sm:$0xff]   ;;  %v789_v4 = vld [vmem:[#allocation5 + $0x40] sm:$0xff]   ;;  %v784_v5 = vld [vmem:[#allocation5 + $0x18] sm:$0xff]   ;;  %s899_s1 = smov [#allocation7]  }
  0x28   :  { %694 = vmatprep.subr.bf16.mxu1 %v897_v0  ;;  %710 = vmatprep.mubr.msk.bf16.mxu1 %vm898_vm0, %v897_v0  ;;  %v790_v6 = vld [vmem:[#allocation5 + $0x48] sm:$0xff]   ;;  %v785_v7 = vld [vmem:[#allocation5 + $0x20] sm:$0xff]   ;;  %v791_v8 = vld [vmem:[#allocation5 + $0x50] sm:$0xff]   ;;  %s579_s6 = sshll.u32 %s899_s1, 4  ;;  %s580_s6 = int_to_ptr.vmem [resolvable:$true] %s579_s6 }
  0x29   :  { %675 = vmatpush3.bf16.msra.mxu0 %v781_v1  ;;  %695 = vmatpush3.bf16.msra.mxu1 %v789_v4  ;;  %v786_v9 = vld [vmem:[#allocation5 + $0x28] sm:$0xff]   ;;  %v792_v10 = vld [vmem:[#allocation5 + $0x58] sm:$0xff]   ;;  %v787_v11 = vld [vmem:[#allocation5 + $0x30] sm:$0xff]   ;;  %s865_s7 = scalar_lea.vmem %s580_s6, 128  ;;  %p870_p3 = scmp.lt.s32.totalorder %s580_s6, %s580_s6 }
  0x2a   :  { %676 = vmatprep.subr.bf16.mxu0 %v897_v0  ;;  %696 = vmatprep.subr.bf16.mxu1 %v897_v0  ;;  %v793_v12 = vld [vmem:[#allocation5 + $0x60] sm:$0xff]   ;;  %v788_v13 = vld [vmem:[#allocation5 + $0x38] sm:$0xff]   ;;  %v794_v14 = vld [vmem:[#allocation5 + $0x68] sm:$0xff]   ;;  %p866_p2 = scmp.ne.s32.totalorder %s580_s6, %s865_s7  ;;  %p871_p4 = scmp.lt.s32.totalorder %s865_s7, %s865_s7 }
  0x2b   :  { %v39_v15 = vld [vmem:[#allocation2] sm:$0xf]  ;;  %v795_v16 = vld [vmem:[#allocation5 + $0x70] sm:$0xff]   ;;  %v797_v18 = vld [vmem:[#allocation5 + $0x80] sm:$0xff]  }
  0x2c   :  { %v796_v17 = vld [vmem:[#allocation5 + $0x78] sm:$0xff]   ;;  %v798_v19 = vld [vmem:[#allocation5 + $0x88] sm:$0xff]   ;;  %v799_v20 = vld [vmem:[#allocation5 + $0x90] sm:$0xff]   ;;  %p872_p5 = por %p871_p4, %p870_p3 }
  0x2d   :  { %677 = vmatpush3.bf16.msra.mxu0 %v782_v2  ;;  %697 = vmatpush3.bf16.msra.mxu1 %v790_v6  ;;  %v800_v21 = vld [vmem:[#allocation5 + $0x98] sm:$0xff]   ;;  %v801_v22 = vld [vmem:[#allocation5 + $0xa0] sm:$0xff]   ;;  %v802_v23 = vld [vmem:[#allocation5 + $0xa8] sm:$0xff]  }
  0x2e   :  { %678 = vmatprep.subr.bf16.mxu0 %v897_v0  ;;  %698 = vmatprep.subr.bf16.mxu1 %v897_v0  ;;  %v803_v24 = vld [vmem:[#allocation5 + $0xb0] sm:$0xff]   ;;  %v804_v31 = vld [vmem:[#allocation5 + $0xb8] sm:$0xff]   ;;  %v805_v32 = vld [vmem:[#allocation5 + $0xc0] sm:$0xff]   ;;  %p873_p6 = pnand %p872_p5, %p866_p2 }
  0x2f   :  { %v806_v33 = vld [vmem:[#allocation5 + $0xc8] sm:$0xff]   ;;  %v807_v34 = vld [vmem:[#allocation5 + $0xd0] sm:$0xff]   ;;  %v808_v35 = vld [vmem:[#allocation5 + $0xd8] sm:$0xff]  }
  0x30   :  { %v809_v36 = vld [vmem:[#allocation5 + $0xe0] sm:$0xff]   ;;  %v810_v37 = vld [vmem:[#allocation5 + $0xe8] sm:$0xff]   ;;  %v811_v38 = vld [vmem:[#allocation5 + $0xf0] sm:$0xff]  }
  0x31   :  { %679 = vmatpush3.bf16.msra.mxu0 %v783_v3  ;;  %699 = vmatpush3.bf16.msra.mxu1 %v791_v8  ;;  %v812_v45 = vld [vmem:[#allocation5 + $0xf8] sm:$0xff]   ;;  %v813_v46 = vld [vmem:[#allocation5 + $0x100] sm:$0xff]   ;;  %v814_v47 = vld [vmem:[#allocation5 + $0x108] sm:$0xff]  }
  0x32   :  { %680 = vmatprep.subr.bf16.mxu0 %v897_v0  ;;  %700 = vmatprep.subr.bf16.mxu1 %v897_v0  ;;  %v815_v48 = vld [vmem:[#allocation5 + $0x110] sm:$0xff]   ;;  %v816_v49 = vld [vmem:[#allocation5 + $0x118] sm:$0xff]   ;;  %v817_v50 = vld [vmem:[#allocation5 + $0x120] sm:$0xff]  }
  0x33   :  { %v818_v51 = vld [vmem:[#allocation5 + $0x128] sm:$0xff]   ;;  %v819_v52 = vld [vmem:[#allocation5 + $0x130] sm:$0xff]   ;;  %v820_v59 = vld [vmem:[#allocation5 + $0x138] sm:$0xff]  }
  0x35   :  { %681 = vmatpush3.bf16.msra.mxu0 %v784_v5  ;;  %701 = vmatpush3.bf16.msra.mxu1 %v792_v10 }
  0x36   :  { %682 = vmatprep.subr.bf16.mxu0 %v897_v0  ;;  %702 = vmatprep.subr.bf16.mxu1 %v897_v0 }
  0x39   :  { %683 = vmatpush3.bf16.msra.mxu0 %v785_v7  ;;  %703 = vmatpush3.bf16.msra.mxu1 %v793_v12 }
  0x3a   :  { %684 = vmatprep.subr.bf16.mxu0 %v897_v0  ;;  %704 = vmatprep.subr.bf16.mxu1 %v897_v0 }
  0x3d   :  { %685 = vmatpush3.bf16.msra.mxu0 %v786_v9  ;;  %705 = vmatpush3.bf16.msra.mxu1 %v794_v14 }
  0x3e   :  { %686 = vmatprep.subr.bf16.mxu0 %v897_v0  ;;  %706 = vmatprep.subr.bf16.mxu1 %v897_v0 }
  0x41   :  { %687 = vmatpush3.bf16.msra.mxu0 %v787_v11  ;;  %707 = vmatpush3.bf16.msra.mxu1 %v795_v16 }
  0x42   :  { %688 = vmatprep.subr.bf16.mxu0 %v897_v0  ;;  %708 = vmatprep.subr.bf16.mxu1 %v897_v0 }
  0x45   :  { %689 = vmatpush3.bf16.msra.mxu0 %v788_v13  ;;  %709 = vmatpush3.bf16.msra.mxu1 %v796_v17 }
  0x46   :  { %714 = vmatprep.subr.bf16.mxu0 %v897_v0  ;;  %734 = vmatprep.subr.bf16.mxu1 %v897_v0 }
  0x48   :  { %691 = vmatmul.mubr.bf16.vlgmr.msra.gmra.mrb[0].mxu0 %v39_v15 }
  0x49   :  { %730 = vmatprep.mubr.msk.bf16.mxu0 %vm898_vm0, %v897_v0  ;;  %715 = vmatpush3.bf16.msra.mxu0 %v797_v18 }
  0x4a   :  { %716 = vmatprep.subr.bf16.mxu0 %v897_v0 }
  0x4d   :  { %717 = vmatpush3.bf16.msra.mxu0 %v798_v19 }
  0x4e   :  { %718 = vmatprep.subr.bf16.mxu0 %v897_v0 }
  0x51   :  { %719 = vmatpush3.bf16.msra.mxu0 %v799_v20 }
  0x52   :  { %720 = vmatprep.subr.bf16.mxu0 %v897_v0 }
  0x55   :  { %721 = vmatpush3.bf16.msra.mxu0 %v800_v21 }
  0x56   :  { %722 = vmatprep.subr.bf16.mxu0 %v897_v0 }
  0x59   :  { %723 = vmatpush3.bf16.msra.mxu0 %v801_v22 }
  0x5a   :  { %724 = vmatprep.subr.bf16.mxu0 %v897_v0 }
  0x5d   :  { %725 = vmatpush3.bf16.msra.mxu0 %v802_v23 }
  0x5e   :  { %726 = vmatprep.subr.bf16.mxu0 %v897_v0 }
  0x61   :  { %727 = vmatpush3.bf16.msra.mxu0 %v803_v24 }
  0x62   :  { %728 = vmatprep.subr.bf16.mxu0 %v897_v0 }
  0x65   :  { %729 = vmatpush3.bf16.msra.mxu0 %v804_v31 }
  0x66   :  { %754 = vmatprep.subr.bf16.mxu0 %v897_v0 }
 0x11b   :  { %v138_v25 = vpop.f32.mrb[0].mxu0 }
 0x11c   :  { %v144_v26 = vmax.f32 %v138_v25, 0.0  ;;  %v692_v27 = vpop.f32.mrb[1].mxu0 }
 0x11d   :  { %v141_v28 = vpop.f32.mrb[2].mxu0 }
 0x11e   :  { %v145_v29 = vpack.c.bf16 %v144_v26, %v144_v26  ;;  %v693_v30 = vpop.f32.mrb[3].mxu0 }
 0x120   :  { %711 = vmatmul.mubr.bf16.vlgmr.msra.gmra.mrb[0].mxu1 %v145_v29 }
 0x121   :  { %750 = vmatprep.mubr.msk.bf16.mxu1 %vm898_vm0, %v897_v0  ;;  %735 = vmatpush3.bf16.msra.mxu1 %v805_v32 }
 0x122   :  { %736 = vmatprep.subr.bf16.mxu1 %v897_v0 }
 0x125   :  { %737 = vmatpush3.bf16.msra.mxu1 %v806_v33 }
 0x126   :  { %738 = vmatprep.subr.bf16.mxu1 %v897_v0 }
 0x129   :  { %739 = vmatpush3.bf16.msra.mxu1 %v807_v34 }
 0x12a   :  { %740 = vmatprep.subr.bf16.mxu1 %v897_v0 }
 0x12d   :  { %741 = vmatpush3.bf16.msra.mxu1 %v808_v35 }
 0x12e   :  { %742 = vmatprep.subr.bf16.mxu1 %v897_v0 }
 0x131   :  { %743 = vmatpush3.bf16.msra.mxu1 %v809_v36 }
 0x132   :  { %744 = vmatprep.subr.bf16.mxu1 %v897_v0 }
 0x135   :  { %745 = vmatpush3.bf16.msra.mxu1 %v810_v37 }
 0x136   :  { %746 = vmatprep.subr.bf16.mxu1 %v897_v0 }
 0x139   :  { %747 = vmatpush3.bf16.msra.mxu1 %v811_v38 }
 0x13a   :  { %748 = vmatprep.subr.bf16.mxu1 %v897_v0 }
 0x13d   :  { %749 = vmatpush3.bf16.msra.mxu1 %v812_v45 }
 0x1f3   :  { %v245_v39 = vpop.f32.mrb[0].mxu1 }
 0x1f4   :  { %v251_v40 = vmax.f32 %v245_v39, 0.0  ;;  %v712_v41 = vpop.f32.mrb[1].mxu1 }
 0x1f5   :  { %v248_v42 = vpop.f32.mrb[2].mxu1 }
 0x1f6   :  { %v252_v43 = vpack.c.bf16 %v251_v40, %v251_v40  ;;  %v713_v44 = vpop.f32.mrb[3].mxu1 }
 0x1f8   :  { %731 = vmatmul.mubr.bf16.vlgmr.msra.gmra.mrb[4].mxu0 %v252_v43 }
 0x1f9   :  { %770 = vmatprep.mubr.msk.bf16.mxu0 %vm898_vm0, %v897_v0  ;;  %755 = vmatpush3.bf16.msra.mxu0 %v813_v46 }
 0x1fa   :  { %756 = vmatprep.subr.bf16.mxu0 %v897_v0 }
 0x1fd   :  { %757 = vmatpush3.bf16.msra.mxu0 %v814_v47 }
 0x1fe   :  { %758 = vmatprep.subr.bf16.mxu0 %v897_v0 }
 0x201   :  { %759 = vmatpush3.bf16.msra.mxu0 %v815_v48 }
 0x202   :  { %760 = vmatprep.subr.bf16.mxu0 %v897_v0 }
 0x205   :  { %761 = vmatpush3.bf16.msra.mxu0 %v816_v49 }
 0x206   :  { %762 = vmatprep.subr.bf16.mxu0 %v897_v0 }
 0x209   :  { %763 = vmatpush3.bf16.msra.mxu0 %v817_v50 }
 0x20a   :  { %764 = vmatprep.subr.bf16.mxu0 %v897_v0 }
 0x20d   :  { %765 = vmatpush3.bf16.msra.mxu0 %v818_v51 }
 0x20e   :  { %766 = vmatprep.subr.bf16.mxu0 %v897_v0 }
 0x211   :  { %767 = vmatpush3.bf16.msra.mxu0 %v819_v52 }
 0x212   :  { %768 = vmatprep.subr.bf16.mxu0 %v897_v0 }
 0x215   :  { %769 = vmatpush3.bf16.msra.mxu0 %v820_v59 }
 0x2cb   :  { %v352_v53 = vpop.f32.mrb[4].mxu0 }
 0x2cc   :  { %v358_v54 = vmax.f32 %v352_v53, 0.0  ;;  %v732_v55 = vpop.f32.mrb[5].mxu0 }
 0x2cd   :  { %v355_v56 = vpop.f32.mrb[6].mxu0 }
 0x2ce   :  { %v359_v57 = vpack.c.bf16 %v358_v54, %v358_v54  ;;  %v733_v58 = vpop.f32.mrb[7].mxu0 }
 0x2d0   :  { %751 = vmatmul.mubr.bf16.vlgmr.msra.gmra.mrb[4].mxu1 %v359_v57 }
 0x3a3   :  { %v459_v60 = vpop.f32.mrb[4].mxu1 }
 0x3a4   :  { %v465_v61 = vmax.f32 %v459_v60, 0.0  ;;  %v752_v62 = vpop.f32.mrb[5].mxu1 }
 0x3a5   :  { %v462_v63 = vpop.f32.mrb[6].mxu1 }
 0x3a6   :  { %v466_v1 = vpack.c.bf16 %v465_v61, %v465_v61  ;;  %v753_v2 = vpop.f32.mrb[7].mxu1 }
 0x3a8   :  { %771 = vmatmul.mubr.bf16.vlgmr.msra.gmra.mrb[8].mxu0 %v466_v1 }
 0x47b   :  { %v566_v0 = vpop.f32.mrb[8].mxu0 }
 0x47c   :  { %572 = vst [vmem:[#allocation7] sm:$0xff] %v566_v0  ;;  %v772_v3 = vpop.f32.mrb[9].mxu0 }
 0x47d   :  { %v569_v4 = vpop.f32.mrb[10].mxu0 }
 0x47e   :  { %876 = shalt.err (!%p873_p6)
}
 0x47f   :  { %s877_s10 = scalar_lea.hbm %s1010_s2, 128 }
 0x480   :  { %p878_p7 = scmp.ne.s32.totalorder %s1010_s2, %s877_s10  ;;  %p881_p8 = scmp.lt.u32.totalorder %s877_s10, %s1010_s2 }
 0x482   :  { %p883_p9 = pnand %p881_p8, %p878_p7 }
 0x484   :  { %886 = shalt.err (!%p883_p9)
}
 0x485   :  { %582 = dma.vmem_to_hbm [thread:$0]  %s580_s6, 128, %s1010_s2, [#allocation4]   ;;  %v773_v5 = vpop.f32.mrb[11].mxu0 }
 0x486   :  { %891 = dma.done.wait [#allocation4], 128  }
 0x487   :  { %892 = vsyncadd [#allocation4], 4294967168 }
 0x488   :  { %586 = vsyncpa [#allocation3], 1 }
 0x489   :  { %587 = vsyncpa [#allocation6], 1 }
 0x48a   :  { %588 = vsyncpa [#allocation4], 1 }

</bundles_post_ra>
